<compile_context>
chip_gen: v6e
topology: v6e:2x2x1
jax: 0.10.0
libtpu: 0.0.40
codegen_flags: <defaults>
</compile_context>

<pallas_src>
import math

import jax
import jax.numpy as jnp
from jax.experimental import pallas as pl
from jax.experimental.pallas import tpu as pltpu


_TR_MAX = 256                      # row (sublane) tile cap
_LANE_HARD_MAX = 32768             # sanity cap on lane tile width
_TARGET_BLOCK_BYTES = 2 * 1024 * 1024   # ~2 MiB per stream per step


def _res_skip_kernel(a_ref, up_ref, skip_ref, out_ref):
    # a_ref block: (TR, 1) float32; up/skip/out blocks: (TR, THW).
    # Math in f32 (kernel is HBM-bound; VALU slack is huge), cast on store.
    up = up_ref[...].astype(jnp.float32)
    skip = skip_ref[...].astype(jnp.float32)
    out_ref[...] = (up + a_ref[...] * skip).astype(out_ref.dtype)


def _cdiv(a, b):
    return -(-a // b)


def _sublane_align(dtype):
    # f32 -> 8, bf16/f16 -> 16, int8/fp8 -> 32 (native (sublane, 128) tiling).
    bits = jnp.dtype(dtype).itemsize * 8
    return max(8, 256 // bits)


def _pick_tile(dim, max_tile, align):
    """Full dim if it fits (always legal), else balanced multiple-of-align tile."""
    if dim <= max_tile:
        return dim
    n_tiles = _cdiv(dim, max_tile)
    return _cdiv(_cdiv(dim, n_tiles), align) * align


def param_res_skip_forward(xb_up, xb_skip, a, *, donate_up=False):
    """out = xb_up + a * xb_skip.

    xb_up, xb_skip: (N, C, *spatial); a: (1, C, 1, ...) PyTorch-style param.
    Handles both the 2D (NCHW) and 3D (NCDHW) variants of the module.
    If donate_up=True the output aliases xb_up's buffer.
    """
    assert xb_up.shape == xb_skip.shape, "xb_up / xb_skip shape mismatch"
    N, C = xb_up.shape[:2]
    HW = int(math.prod(xb_up.shape[2:]))
    R = N * C
    itemsize = jnp.dtype(xb_up.dtype).itemsize

    up_f = xb_up.reshape(R, HW)
    skip_f = xb_skip.reshape(R, HW)
    # Per-row scale (row r carries channel r % C). Tiny (R, 1) f32 array, kept
    # at full precision so the learnable parameter is never quantized.
    a_rows = jnp.broadcast_to(
        a.reshape(1, C).astype(jnp.float32), (N, C)
    ).reshape(R, 1)

    # Row tile: up to 256 rows, aligned to the dtype's native sublane packing.
    tr = _pick_tile(R, _TR_MAX, _sublane_align(xb_up.dtype))
    # Lane tile: widen so each step moves ~2 MiB per stream (amortizes the
    # ~0.35 us fixed per-step pipeline overhead), balanced over HW.
    thw_budget = _TARGET_BLOCK_BYTES // max(tr * itemsize, 1)
    thw_budget = max(128, min((thw_budget // 128) * 128, _LANE_HARD_MAX))
    thw = _pick_tile(HW, thw_budget, 128)

    grid = (_cdiv(R, tr), _cdiv(HW, thw))

    cost = pl.CostEstimate(
        flops=2 * R * HW,
        transcendentals=0,
        bytes_accessed=3 * R * HW * itemsize + R * 4,
    )

    kwargs = {}
    if donate_up:
        # inputs are (a_rows, up_f, skip_f) -> xb_up buffer is input index 1.
        kwargs["input_output_aliases"] = {1: 0}

    out = pl.pallas_call(
        _res_skip_kernel,
        out_shape=jax.ShapeDtypeStruct((R, HW), xb_up.dtype),
        grid_spec=pltpu.PrefetchScalarGridSpec(
            num_scalar_prefetch=0,
            grid=grid,
            in_specs=[
                # Scale block depends only on the row tile -> stays resident
                # across all HW steps (no re-DMA).
                pl.BlockSpec((tr, 1), lambda r, h: (r, 0)),
                pl.BlockSpec((tr, thw), lambda r, h: (r, h)),  # xb_up
                pl.BlockSpec((tr, thw), lambda r, h: (r, h)),  # xb_skip
            ],
            out_specs=pl.BlockSpec((tr, thw), lambda r, h: (r, h)),
        ),
        compiler_params=pltpu.CompilerParams(
            dimension_semantics=("parallel", "parallel"),
        ),
        cost_estimate=cost,
        **kwargs,
    )(a_rows, up_f, skip_f)

    return out.reshape(xb_up.shape)


if __name__ == "__main__":
    key = jax.random.PRNGKey(0)
    keys = jax.random.split(key, 12)

    # --- Case 1: small 2D shapes matching the module defaults --------------
    N, C, H, W = 2, 4, 16, 16
    xb_up = jax.random.normal(keys[0], (N, C, H, W), dtype=jnp.float32)
    xb_skip = jax.random.normal(keys[1], (N, C, H, W), dtype=jnp.float32)

    # PyTorch __init__ zero-inits `a` -> output must equal xb_up exactly.
    a_zero = jnp.zeros((1, C, 1, 1), dtype=jnp.float32)
    out_zero = jax.block_until_ready(param_res_skip_forward(xb_up, xb_skip, a_zero))
    assert jnp.allclose(out_zero, xb_up, atol=1e-6), "zero-param case mismatch"

    a_rand = jax.random.normal(keys[2], (1, C, 1, 1), dtype=jnp.float32)
    out = jax.block_until_ready(param_res_skip_forward(xb_up, xb_skip, a_rand))
    ref = xb_up + a_rand * xb_skip
    assert jnp.allclose(out, ref, atol=1e-6), "broadcast case mismatch"

    # --- Case 2: 3D variant of the module (is_2d=False) --------------------
    N3, C3, D3, H3, W3 = 1, 4, 4, 8, 8
    up3 = jax.random.normal(keys[3], (N3, C3, D3, H3, W3), dtype=jnp.float32)
    skip3 = jax.random.normal(keys[4], (N3, C3, D3, H3, W3), dtype=jnp.float32)
    a3 = jax.random.normal(keys[5], (1, C3, 1, 1, 1), dtype=jnp.float32)
    out3 = jax.block_until_ready(param_res_skip_forward(up3, skip3, a3))
    ref3 = up3 + a3 * skip3
    assert jnp.allclose(out3, ref3, atol=1e-6), "3D case mismatch"

    # --- Case 3: exercises row + lane tiling (R=512 rows, HW=2304) ---------
    N4, C4, H4, W4 = 2, 256, 48, 48
    up4 = jax.random.normal(keys[6], (N4, C4, H4, W4), dtype=jnp.float32)
    skip4 = jax.random.normal(keys[7], (N4, C4, H4, W4), dtype=jnp.float32)
    a4 = jax.random.normal(keys[8], (1, C4, 1, 1), dtype=jnp.float32)
    out4 = jax.block_until_ready(param_res_skip_forward(up4, skip4, a4))
    ref4 = up4 + a4 * skip4
    assert jnp.allclose(out4, ref4, atol=1e-5), "tiled case mismatch"

    # --- Case 4: bf16 activations, f32 parameter (f32 compute path) --------
    up5 = jax.random.normal(keys[9], (N, C, H, W), dtype=jnp.bfloat16)
    skip5 = jax.random.normal(keys[10], (N, C, H, W), dtype=jnp.bfloat16)
    a5 = jax.random.normal(keys[11], (1, C, 1, 1), dtype=jnp.float32)
    out5 = jax.block_until_ready(param_res_skip_forward(up5, skip5, a5))
    ref5 = (up5.astype(jnp.float32) + a5 * skip5.astype(jnp.float32)).astype(jnp.bfloat16)
    assert jnp.allclose(
        out5.astype(jnp.float32), ref5.astype(jnp.float32), atol=1e-2
    ), "bf16 case mismatch"

    print("KERNEL_OK")
</pallas_src>

<mosaic_0001>
module attributes {stable_mosaic.version = 11 : i64} {
  func.func @_res_skip_kernel(%arg0: i32, %arg1: i32, %arg2: memref<8x1xf32, #tpu.memory_space<vmem>>, %arg3: memref<8x256xf32, #tpu.memory_space<vmem>>, %arg4: memref<8x256xf32, #tpu.memory_space<vmem>>, %arg5: memref<8x256xf32, #tpu.memory_space<vmem>>) attributes {dimension_semantics = [#tpu.dimension_semantics<parallel>, #tpu.dimension_semantics<parallel>], iteration_bounds = array<i64: 1, 1>, scalar_prefetch = 0 : i64, scratch_operands = 0 : i64, tpu.core_type = #tpu.core_type<tc>, window_params = [{transform_indices = @transform_0, window_bounds = array<i64: 8, 1>}, {transform_indices = @transform_1, window_bounds = array<i64: 8, 256>}, {transform_indices = @transform_2, window_bounds = array<i64: 8, 256>}, {transform_indices = @transform_3, window_bounds = array<i64: 8, 256>}]} {
    %c0 = arith.constant 0 : index
    %c0_0 = arith.constant 0 : index
    %0 = vector.load %arg3[%c0, %c0_0] : memref<8x256xf32, #tpu.memory_space<vmem>>, vector<8x256xf32>
    %c0_1 = arith.constant 0 : index
    %c0_2 = arith.constant 0 : index
    %1 = vector.load %arg4[%c0_1, %c0_2] : memref<8x256xf32, #tpu.memory_space<vmem>>, vector<8x256xf32>
    %c0_3 = arith.constant 0 : index
    %c0_4 = arith.constant 0 : index
    %2 = vector.load %arg2[%c0_3, %c0_4] : memref<8x1xf32, #tpu.memory_space<vmem>>, vector<8x1xf32>
    %3 = vector.broadcast %2 : vector<8x1xf32> to vector<8x256xf32>
    %4 = arith.mulf %3, %1 : vector<8x256xf32>
    %5 = arith.addf %0, %4 : vector<8x256xf32>
    %c0_5 = arith.constant 0 : index
    %c0_6 = arith.constant 0 : index
    %6 = vector.load %arg5[%c0_5, %c0_6] : memref<8x256xf32, #tpu.memory_space<vmem>>, vector<8x256xf32>
    tpu.vector_store %arg5[%c0_5, %c0_6], %5 {strides = array<i32>} : memref<8x256xf32, #tpu.memory_space<vmem>>, vector<8x256xf32>,
    return
  }
  func.func @transform_0(%arg0: i32, %arg1: i32) -> (i32, i32) {
    %c0_i32 = arith.constant 0 : i32
    %c0_i32_0 = arith.constant 0 : i32
    return %arg0, %c0_i32 : i32, i32
  }
  func.func @transform_1(%arg0: i32, %arg1: i32) -> (i32, i32) {
    %c0_i32 = arith.constant 0 : i32
    return %arg0, %arg1 : i32, i32
  }
  func.func @transform_2(%arg0: i32, %arg1: i32) -> (i32, i32) {
    %c0_i32 = arith.constant 0 : i32
    return %arg0, %arg1 : i32, i32
  }
  func.func @transform_3(%arg0: i32, %arg1: i32) -> (i32, i32) {
    %c0_i32 = arith.constant 0 : i32
    return %arg0, %arg1 : i32, i32
  }
}

</mosaic_0001>

<bundles_post_ra>
// kernel: tpu_custom_call.1
= control target key start
LH: loop header
LB: loop body
LE: loop exit
PB: predicated region body
PF: predicated region fallthrough
CT: control target
= control target key end

     0   :  { %8 = vsyncpa [#allocation3], 0  ;;  %s178_s0 = inlined_call_operand.vmem [shape: f32[8,1], index: 0, kind: input, shape index: {}]   ;;  %s179_s1 = inlined_call_operand.hbm [shape: f32[8,256], index: 1, kind: input, shape index: {}]   ;;  %s180_s2 = inlined_call_operand.hbm [shape: f32[8,256], index: 2, kind: input, shape index: {}]   ;;  %s181_s3 = inlined_call_operand.hbm [shape: f32[8,256], index: 3, kind: output, shape index: {}]  }
   0x1   :  { %9 = vsyncpa [#allocation6], 0 }
   0x2   :  { %10 = vsyncpa [#allocation4], 0  ;;  %s142_s12 = smov [#allocation2]   ;;  %s143_s14 = smov [#allocation5]  }
   0x3   :  { %s19_s13 = sshll.u32 %s142_s12, 4  ;;  %s29_s15 = sshll.u32 %s143_s14, 4  ;;  %s20_s13 = int_to_ptr.vmem [resolvable:$true] %s19_s13  ;;  %s30_s15 = int_to_ptr.vmem [resolvable:$true] %s29_s15 }
   0x4   :  { %s84_s16 = scalar_lea.vmem %s20_s13, 256  ;;  %p89_p1 = scmp.lt.s32.totalorder %s20_s13, %s20_s13 }
   0x5   :  { %p85_p0 = scmp.ne.s32.totalorder %s20_s13, %s84_s16  ;;  %p90_p2 = scmp.lt.s32.totalorder %s84_s16, %s84_s16 }
   0x7   :  { %p91_p3 = por %p90_p2, %p89_p1 }
   0x9   :  { %p92_p4 = pnand %p91_p3, %p85_p0 }
   0xb   :  { %95 = shalt.err (!%p92_p4)
}
   0xc   :  { %22 = dma.hbm_to_vmem [thread:$0]  %s179_s1, 256, %s20_s13, [#allocation3]  }
   0xd   :  { %s104_s19 = scalar_lea.vmem %s30_s15, 256  ;;  %p109_p6 = scmp.lt.s32.totalorder %s30_s15, %s30_s15 }
   0xe   :  { %p105_p5 = scmp.ne.s32.totalorder %s30_s15, %s104_s19  ;;  %p110_p7 = scmp.lt.s32.totalorder %s104_s19, %s104_s19 }
  0x10   :  { %p111_p8 = por %p110_p7, %p109_p6 }
  0x12   :  { %p112_p9 = pnand %p111_p8, %p105_p5 }
  0x14   :  { %115 = shalt.err (!%p112_p9)
}
  0x15   :  { %32 = dma.hbm_to_vmem [thread:$0]  %s180_s2, 256, %s30_s15, [#allocation6]  }
  0x16   :  { %136 = dma.done.wait [#allocation3], 256  }
  0x17   :  { %137 = vsyncadd [#allocation3], 4294967040 }
  0x18   :  { %138 = dma.done.wait [#allocation6], 256  }
  0x19   :  { %139 = vsyncadd [#allocation6], 4294967040  ;;  %v144_v0 = vmov 0   ;;  %v43_v1 = vld [vmem:[%s178_s0] sm:$0xff]  ;;  %v41_v2 = vld [vmem:[#allocation5] sm:$0xff]  ;;  %s145_s1 = smov [#allocation7]  }
  0x1a   :  { %75 = vset.pattern.permute.xlu0 %v144_v0  ;;  %v42_v3 = vld [vmem:[#allocation5 + $0x8] sm:$0xff]  ;;  %v39_v5 = vld [vmem:[#allocation2] sm:$0xff]  ;;  %v40_v6 = vld [vmem:[#allocation2 + $0x8] sm:$0xff]  ;;  %s61_s24 = sshll.u32 %s145_s1, 4  ;;  %s62_s24 = int_to_ptr.vmem [resolvable:$true] %s61_s24 }
  0x1b   :  { %46 = vperm.xlu0 %75, %v43_v1   ;;  %s116_s2 = scalar_lea.vmem %s62_s24, 256  ;;  %p121_p11 = scmp.lt.s32.totalorder %s62_s24, %s62_s24 }
  0x1c   :  { %p117_p10 = scmp.ne.s32.totalorder %s62_s24, %s116_s2  ;;  %p122_p12 = scmp.lt.s32.totalorder %s116_s2, %s116_s2 }
  0x1e   :  { %p123_p13 = por %p122_p12, %p121_p11 }
  0x20   :  { %p124_p0 = pnand %p123_p13, %p117_p10 }
  0x96   :  { %v47_v4 = vpop.permute.xlu0 %46 }
  0x97   :  { %v49_v7 = vmul.f32 %v47_v4, %v41_v2  ;;  %v50_v8 = vmul.f32 %v47_v4, %v42_v3 }
  0x99   :  { %v51_v9 = vadd.f32 %v49_v7, %v39_v5  ;;  %v52_v10 = vadd.f32 %v50_v8, %v40_v6 }
  0x9b   :  { %53 = vst [vmem:[#allocation7] sm:$0xff] %v51_v9  ;;  %54 = vst [vmem:[#allocation7 + $0x8] sm:$0xff] %v52_v10 }
  0x9c   :  { %127 = shalt.err (!%p124_p0)
}
  0x9d   :  { %64 = dma.vmem_to_hbm [thread:$0]  %s62_s24, 256, %s181_s3, [#allocation4]  }
  0x9e   :  { %140 = dma.done.wait [#allocation4], 256  }
  0x9f   :  { %141 = vsyncadd [#allocation4], 4294967040 }
  0xa0   :  { %68 = vsyncpa [#allocation3], 1 }
  0xa1   :  { %69 = vsyncpa [#allocation6], 1 }
  0xa2   :  { %70 = vsyncpa [#allocation4], 1 }

</bundles_post_ra>
